<compile_context>
chip_gen: v7x
topology: tpu7x:2x2x1
jax: 0.10.0
libtpu: 0.0.40
codegen_flags: <defaults>
</compile_context>

<pallas_src>
import functools

import jax
import jax.numpy as jnp
from jax import lax
from jax.experimental import pallas as pl
from jax.experimental.pallas import tpu as pltpu

LRELU_SLOPE = 0.1
HALO_BLK = 128                      # lane granularity of halo blocks


def _pick_tile_and_vmem():
    """v5e/v6e have 128 MiB physical VMEM -> big tiles; v7x only 64 MiB -> conservative."""
    try:
        cap = int(getattr(pltpu.get_tpu_info(), "vmem_capacity_bytes", 0))
    except Exception:
        cap = 0
    if cap >= 100 * 1024 * 1024:
        return 1024, 96 * 1024 * 1024
    return 512, 48 * 1024 * 1024


LANE_TILE, VMEM_LIMIT = _pick_tile_and_vmem()


def get_padding(kernel_size, dilation=1):
    return int((kernel_size * dilation - dilation) / 2)


def _cdiv(a, b):
    return -(-a // b)


# =============================================================================
# Generic fused Conv1d kernels:
#   y = [tanh]( sum_i W_i @ shift_i( [lrelu]( x [+ add] ) ) + b )
# Weights are (K, rows, C_in) bf16; taps are accumulated (no im2col materialization).
# =============================================================================
@functools.lru_cache(maxsize=None)
def _build_conv_full(B, C_in, rows, K, offs, pad_l, pad_r, t_out, t_in,
                     has_add, lrelu_slope, post_tanh, out_dtype):
    """Single-block (whole time axis) variant; conv padding applied in VMEM."""
    out_dt = jnp.dtype(out_dtype)

    def kernel(*refs):
        o_ref, b_ref, w_ref = refs[-1], refs[-2], refs[-3]
        x = refs[0][0].astype(jnp.float32)
        if has_add:
            x = x + refs[1][0].astype(jnp.float32)
        if lrelu_slope is not None:
            x = jnp.where(x >= 0, x, lrelu_slope * x)
        xb = x.astype(jnp.bfloat16)
        if pad_l or pad_r:
            pieces = []
            if pad_l:
                pieces.append(jnp.zeros((C_in, pad_l), jnp.bfloat16))
            pieces.append(xb)
            if pad_r:
                pieces.append(jnp.zeros((C_in, pad_r), jnp.bfloat16))
            xb = jnp.concatenate(pieces, axis=1)
        acc = jnp.zeros((rows, t_out), jnp.float32)
        for i in range(K):
            acc = acc + jnp.dot(w_ref[i], xb[:, offs[i]:offs[i] + t_out],
                                preferred_element_type=jnp.float32)
        y = acc + b_ref[...]
        if post_tanh:
            y = jnp.tanh(y)
        o_ref[...] = y[None].astype(out_dt)

    in_specs = [pl.BlockSpec((1, C_in, t_in), lambda b: (b, 0, 0))]
    if has_add:
        in_specs.append(pl.BlockSpec((1, C_in, t_in), lambda b: (b, 0, 0)))
    in_specs += [pl.BlockSpec((K, rows, C_in), lambda b: (0, 0, 0)),
                 pl.BlockSpec((rows, 1), lambda b: (0, 0))]
    return pl.pallas_call(
        kernel,
        out_shape=jax.ShapeDtypeStruct((B, rows, t_out), out_dt),
        grid=(B,),
        in_specs=in_specs,
        out_specs=pl.BlockSpec((1, rows, t_out), lambda b: (b, 0, 0)),
        compiler_params=pltpu.CompilerParams(
            dimension_semantics=("parallel",),
            vmem_limit_bytes=VMEM_LIMIT),
    )


@functools.lru_cache(maxsize=None)
def _build_conv_tiled(B, C_in, rows, K, soffs, T, nt, has_add,
                      lrelu_slope, post_tanh, out_dtype):
    """Time-tiled variant.  grid=(B, nt).  The +/-128-lane halo is supplied by two extra
    128-lane BlockSpecs on the same array (clamped index_map); global edges are handled
    by an in-kernel validity mask, so no XLA-side conv padding of the activation."""
    TT, HW = LANE_TILE, HALO_BLK
    W = TT + 2 * HW
    nb = TT // HW
    last_blk = nt * nb - 1
    out_dt = jnp.dtype(out_dtype)

    def kernel(*refs):
        o_ref, b_ref, w_ref = refs[-1], refs[-2], refs[-3]
        t = pl.program_id(1)
        xw = jnp.concatenate([refs[0][0], refs[1][0], refs[2][0]],
                             axis=1).astype(jnp.float32)
        if has_add:
            aw = jnp.concatenate([refs[3][0], refs[4][0], refs[5][0]],
                                 axis=1).astype(jnp.float32)
            xw = xw + aw
        col = lax.broadcasted_iota(jnp.int32, (1, W), 1) + (t * TT - HW)
        valid = (col >= 0) & (col < T)
        xw = jnp.where(valid, xw, 0.0)
        if lrelu_slope is not None:
            xw = jnp.where(xw >= 0, xw, lrelu_slope * xw)
        xb = xw.astype(jnp.bfloat16)
        acc = jnp.zeros((rows, TT), jnp.float32)
        for i in range(K):
            s0 = HW + soffs[i]
            acc = acc + jnp.dot(w_ref[i], xb[:, s0:s0 + TT],
                                preferred_element_type=jnp.float32)
        y = acc + b_ref[...]
        if post_tanh:
            y = jnp.tanh(y)
        o_ref[...] = y[None].astype(out_dt)

    def window_specs():
        return [
            pl.BlockSpec((1, C_in, HW),
                         lambda b, t: (b, 0, jnp.maximum(t * nb - 1, 0))),
            pl.BlockSpec((1, C_in, TT), lambda b, t: (b, 0, t)),
            pl.BlockSpec((1, C_in, HW),
                         lambda b, t: (b, 0, jnp.minimum((t + 1) * nb, last_blk))),
        ]

    in_specs = window_specs()
    if has_add:
        in_specs += window_specs()
    in_specs += [pl.BlockSpec((K, rows, C_in), lambda b, t: (0, 0, 0)),
                 pl.BlockSpec((rows, 1), lambda b, t: (0, 0))]
    return pl.pallas_call(
        kernel,
        out_shape=jax.ShapeDtypeStruct((B, rows, nt * TT), out_dt),
        grid=(B, nt),
        in_specs=in_specs,
        out_specs=pl.BlockSpec((1, rows, TT), lambda b, t: (b, 0, t)),
        compiler_params=pltpu.CompilerParams(
            dimension_semantics=("parallel", "parallel"),
            vmem_limit_bytes=VMEM_LIMIT),
    )


def _conv_core(x, add, w, b, soffs, t_out, *, lrelu_slope, post_tanh, out_dtype):
    """x: (B, C_in, T), w: (K, rows, C_in) bf16, soffs: signed tap offsets (input col of
    output col j for tap i is j + soffs[i]; out-of-range input cols are zero)."""
    B, C_in, T = x.shape
    K, rows, _ = w.shape
    soffs = tuple(int(v) for v in soffs)
    slope = None if lrelu_slope is None else float(lrelu_slope)
    dt_name = jnp.dtype(out_dtype).name
    has_add = add is not None
    TT = LANE_TILE
    nt = _cdiv(t_out, TT)
    if (t_out == T and nt >= 2
            and min(soffs) >= -HALO_BLK and max(soffs) <= HALO_BLK):
        t_pad = nt * TT
        if t_pad != T:
            x = jnp.pad(x, ((0, 0), (0, 0), (0, t_pad - T)))
            if has_add:
                add = jnp.pad(add, ((0, 0), (0, 0), (0, t_pad - T)))
        call = _build_conv_tiled(B, C_in, rows, K, soffs, T, nt, has_add,
                                 slope, bool(post_tanh), dt_name)
        args = (x, x, x) + ((add, add, add) if has_add else ()) + (w, b)
        y = call(*args)
        return y[:, :, :t_out] if t_pad != t_out else y
    pad_l = max(0, -min(soffs))
    pad_r = max(0, max(soffs) + t_out - T)
    offs = tuple(v + pad_l for v in soffs)
    call = _build_conv_full(B, C_in, rows, K, offs, pad_l, pad_r, t_out, T,
                            has_add, slope, bool(post_tanh), dt_name)
    args = (x,) + ((add,) if has_add else ()) + (w, b)
    return call(*args)


def pallas_conv1d(x, p, *, dilation=1, padding=0, add=None, lrelu_slope=None,
                  post_tanh=False, out_dtype=jnp.bfloat16):
    """Conv1d (stride 1).  x: (B, C_in, T).  p from pack_conv.  `add` is fused in
    before the (optional) leaky_relu."""
    _, _, T = x.shape
    K = p["k"]
    t_out = T + 2 * padding - (K - 1) * dilation
    soffs = tuple(i * dilation - padding for i in range(K))
    return _conv_core(x, add, p["w"], p["b"], soffs, t_out,
                      lrelu_slope=lrelu_slope, post_tanh=post_tanh,
                      out_dtype=out_dtype)


def pallas_conv_transpose1d(x, p, *, add=None, lrelu_slope=None,
                            out_dtype=jnp.bfloat16):
    """ConvTranspose1d via polyphase decomposition (no zero-insertion): the matmul runs
    over the un-upsampled time axis, then the phases are interleaved."""
    B, _, T = x.shape
    s, c_out = p["stride"], p["c_out"]
    y = _conv_core(x, add, p["w"], p["b"], p["soffs"], T,
                   lrelu_slope=lrelu_slope, post_tanh=False, out_dtype=out_dtype)
    # TODO(synk): fuse this phase interleave into the kernel (strided lane store or a
    # bf16-pair bitcast) to remove one extra HBM round trip of the upsampled tensor.
    return y.reshape(B, s, c_out, T).transpose(0, 2, 3, 1).reshape(B, c_out, T * s)


# =============================================================================
# Fused ResBlock stage: x -> mean_j ResBlock_j(x) in one pallas_call.
# Weights per resblock: (8*k, C, C) bf16 in conv order [c1_0, c2_0, c1_1, c2_1, ...]
# (tap-minor), biases (8, C, 1) f32.
# =============================================================================
@functools.lru_cache(maxsize=None)
def _build_rb_full(B, C, T, rb_cfg, slope, out_dtype):
    """Whole-time-axis variant (small T)."""
    n_rb = len(rb_cfg)
    inv_n = 1.0 / n_rb
    out_dt = jnp.dtype(out_dtype)

    def same_conv(t, w_ref, b_ref, li, k, d):
        p = (k - 1) * d // 2
        tb = t.astype(jnp.bfloat16)
        if p:
            z = jnp.zeros((C, p), jnp.bfloat16)
            tb = jnp.concatenate([z, tb, z], axis=1)
        acc = jnp.zeros((C, T), jnp.float32)
        for i in range(k):
            acc = acc + jnp.dot(w_ref[li * k + i], tb[:, i * d:i * d + T],
                                preferred_element_type=jnp.float32)
        return acc + b_ref[li]

    def kernel(*refs):
        o_ref = refs[-1]
        x = refs[0][0].astype(jnp.float32)
        xs = jnp.zeros((C, T), jnp.float32)
        for j, (k, dils) in enumerate(rb_cfg):
            w_ref, b_ref = refs[1 + 2 * j], refs[2 + 2 * j]
            cur = x
            for it in range(4):
                t1 = jnp.where(cur >= 0, cur, slope * cur)
                h = same_conv(t1, w_ref, b_ref, 2 * it, k, dils[it])
                t2 = jnp.where(h >= 0, h, slope * h)
                h2 = same_conv(t2, w_ref, b_ref, 2 * it + 1, k, 1)
                cur = cur + h2
            xs = xs + cur
        o_ref[...] = (xs * inv_n)[None].astype(out_dt)

    in_specs = [pl.BlockSpec((1, C, T), lambda b: (b, 0, 0))]
    for (k, _d) in rb_cfg:
        in_specs.append(pl.BlockSpec((8 * k, C, C), lambda b: (0, 0, 0)))
        in_specs.append(pl.BlockSpec((8, C, 1), lambda b: (0, 0, 0)))
    return pl.pallas_call(
        kernel,
        out_shape=jax.ShapeDtypeStruct((B, C, T), out_dt),
        grid=(B,),
        in_specs=in_specs,
        out_specs=pl.BlockSpec((1, C, T), lambda b: (b, 0, 0)),
        compiler_params=pltpu.CompilerParams(
            dimension_semantics=("parallel",),
            vmem_limit_bytes=VMEM_LIMIT),
    )


@functools.lru_cache(maxsize=None)
def _build_rb_tiled(B, C, T, nt, HW, rb_cfg, slope, out_dtype):
    """Time-tiled fused ResBlock stage.  Each tile computes on a (C, TT + 2*HW) window
    (HW >= the accumulated receptive half-width of the 8-conv chain).  Convs run in
    'valid' mode so the window shrinks; every conv output is re-masked against the true
    [0, T) range so global-edge zero padding matches the PyTorch reference exactly."""
    TT = LANE_TILE
    W = TT + 2 * HW
    nb = TT // HW
    last_blk = nt * nb - 1
    n_rb = len(rb_cfg)
    inv_n = 1.0 / n_rb
    out_dt = jnp.dtype(out_dtype)

    def kernel(*refs):
        o_ref = refs[-1]
        t = pl.program_id(1)
        xw = jnp.concatenate([refs[0][0], refs[1][0], refs[2][0]],
                             axis=1).astype(jnp.float32)
        col = lax.broadcasted_iota(jnp.int32, (1, W), 1) + (t * TT - HW)
        valid = (col >= 0) & (col < T)
        xw = jnp.where(valid, xw, 0.0)
        xs = jnp.zeros((C, TT), jnp.float32)
        for j, (k, dils) in enumerate(rb_cfg):
            w_ref, b_ref = refs[3 + 2 * j], refs[4 + 2 * j]

            def valid_conv(a, li, d, wd_out, k=k, w_ref=w_ref, b_ref=b_ref):
                ab = a.astype(jnp.bfloat16)
                acc = jnp.zeros((C, wd_out), jnp.float32)
                for i in range(k):
                    acc = acc + jnp.dot(w_ref[li * k + i],
                                        ab[:, i * d:i * d + wd_out],
                                        preferred_element_type=jnp.float32)
                return acc + b_ref[li]

            cur, off, wd = xw, 0, W
            for it in range(4):
                d1 = dils[it]
                p1 = (k - 1) * d1 // 2
                p2 = (k - 1) // 2
                t1 = jnp.where(cur >= 0, cur, slope * cur)
                w1 = wd - 2 * p1
                h1 = valid_conv(t1, 2 * it, d1, w1)
                o1 = off + p1
                h1 = jnp.where(valid[:, o1:o1 + w1], h1, 0.0)
                t2 = jnp.where(h1 >= 0, h1, slope * h1)
                w2 = w1 - 2 * p2
                h2 = valid_conv(t2, 2 * it + 1, 1, w2)
                o2 = o1 + p2
                h2 = jnp.where(valid[:, o2:o2 + w2], h2, 0.0)
                cur = cur[:, o2 - off:o2 - off + w2] + h2
                off, wd = o2, w2
            xs = xs + cur[:, HW - off:HW - off + TT]
        o_ref[...] = (xs * inv_n)[None].astype(out_dt)

    in_specs = [
        pl.BlockSpec((1, C, HW), lambda b, t: (b, 0, jnp.maximum(t * nb - 1, 0))),
        pl.BlockSpec((1, C, TT), lambda b, t: (b, 0, t)),
        pl.BlockSpec((1, C, HW),
                     lambda b, t: (b, 0, jnp.minimum((t + 1) * nb, last_blk))),
    ]
    # TODO(synk): for very large C (>=512) the resident per-resblock weight slabs exceed
    # v7x VMEM; add an 'arbitrary' per-resblock grid axis that streams one slab at a time.
    for (k, _d) in rb_cfg:
        in_specs.append(pl.BlockSpec((8 * k, C, C), lambda b, t: (0, 0, 0)))
        in_specs.append(pl.BlockSpec((8, C, 1), lambda b, t: (0, 0, 0)))
    return pl.pallas_call(
        kernel,
        out_shape=jax.ShapeDtypeStruct((B, C, nt * TT), out_dt),
        grid=(B, nt),
        in_specs=in_specs,
        out_specs=pl.BlockSpec((1, C, TT), lambda b, t: (b, 0, t)),
        compiler_params=pltpu.CompilerParams(
            dimension_semantics=("parallel", "parallel"),
            vmem_limit_bytes=VMEM_LIMIT),
    )


def _stage_halo(rb_cfg):
    H = 0
    for k, dils in rb_cfg:
        H = max(H, sum((k - 1) * d // 2 + (k - 1) // 2 for d in dils))
    return H


def _pick_halo(H, TT):
    hw = HALO_BLK
    while hw < H:
        hw += HALO_BLK
    while hw <= TT and TT % hw != 0:
        hw += HALO_BLK
    if hw > TT or hw < H:
        return None
    return hw


def resblock_stage(x, stage_params, rb_cfg, out_dtype=jnp.bfloat16):
    B, C, T = x.shape
    rb_cfg = tuple((int(k), tuple(int(d) for d in ds)) for k, ds in rb_cfg)
    dt_name = jnp.dtype(out_dtype).name
    wb = []
    for p in stage_params:
        wb += [p["w"], p["b"]]
    TT = LANE_TILE
    nt = _cdiv(T, TT)
    hw = _pick_halo(_stage_halo(rb_cfg), TT)
    if nt >= 2 and hw is not None:
        t_pad = nt * TT
        xp = jnp.pad(x, ((0, 0), (0, 0), (0, t_pad - T))) if t_pad != T else x
        call = _build_rb_tiled(B, C, T, nt, hw, rb_cfg, float(LRELU_SLOPE), dt_name)
        y = call(xp, xp, xp, *wb)
        return y[:, :, :T] if t_pad != T else y
    call = _build_rb_full(B, C, T, rb_cfg, float(LRELU_SLOPE), dt_name)
    return call(x, *wb)


# =============================================================================
# Parameter packing (PyTorch layouts -> per-tap bf16 weights; weight_norm folded)
# =============================================================================
def pack_conv(w_pt, b):
    """Conv1d weight (C_out, C_in, K) -> (K, C_out, C_in) bf16."""
    c_out, c_in, k = w_pt.shape
    w = jnp.transpose(w_pt, (2, 0, 1)).astype(jnp.bfloat16)
    return {"w": w, "b": b.reshape(c_out, 1).astype(jnp.float32), "k": k}


def pack_conv_transpose(w_pt, b, *, stride, padding):
    """ConvTranspose1d weight (C_in, C_out, K) -> polyphase (|M|, stride*C_out, C_in)."""
    c_in, c_out, K = w_pt.shape
    s, p = stride, padding
    assert K - 2 * p == s, "polyphase path assumes K - 2*padding == stride"
    taps, ms = [], set()
    for r in range(s):
        for k in range(K):
            if (k - r - p) % s == 0:
                m = (k - r - p) // s
                taps.append((m, r, k))
                ms.add(m)
    m_sorted = sorted(ms, reverse=True)
    m_idx = {m: i for i, m in enumerate(m_sorted)}
    w = jnp.zeros((len(m_sorted), s * c_out, c_in), jnp.float32)
    for (m, r, k) in taps:
        w = w.at[m_idx[m], r * c_out:(r + 1) * c_out, :].set(w_pt[:, :, k].T)
    b_slab = jnp.tile(b.reshape(1, c_out), (s, 1)).reshape(s * c_out, 1)
    return {"w": w.astype(jnp.bfloat16), "b": b_slab.astype(jnp.float32),
            "soffs": tuple(int(-m) for m in m_sorted), "stride": s, "c_out": c_out}


def pack_resblock(convs, ch, k):
    """convs: 8 (w (ch,ch,k), b (ch,)) in order [c1_0, c2_0, c1_1, c2_1, ...]."""
    w = jnp.concatenate([jnp.transpose(wi, (2, 0, 1)) for (wi, _b) in convs], axis=0)
    b = jnp.stack([bi for (_w, bi) in convs]).reshape(8, ch, 1)
    return {"w": w.astype(jnp.bfloat16), "b": b.astype(jnp.float32), "k": k}


def init_generator_params(key, cfg):
    U = cfg["upsample_init_channel"]
    mel = cfg["mel_dim"]
    rates = cfg["upsample_rates"]
    uks = cfg["upsample_kernel_sizes"]
    top_k = cfg["top_k"]
    num_up = len(rates)
    keys = iter(jax.random.split(key, 1024))

    def conv_w(c_in, c_out, k):        # PyTorch Conv1d layout (C_out, C_in, K)
        return (jax.random.normal(next(keys), (c_out, c_in, k), jnp.float32) * 0.05,
                jax.random.normal(next(keys), (c_out,), jnp.float32) * 0.05)

    def convT_w(c_in, c_out, k):       # PyTorch ConvTranspose1d layout (C_in, C_out, K)
        return (jax.random.normal(next(keys), (c_in, c_out, k), jnp.float32) * 0.05,
                jax.random.normal(next(keys), (c_out,), jnp.float32) * 0.05)

    params = {"conv_pre": pack_conv(*conv_w(mel, U, 7)),
              "ups": [], "nn_up": [], "resid": []}
    init_ch = mel
    for i, (u, k) in enumerate(zip(rates, uks)):
        params["ups"].append(pack_conv_transpose(
            *convT_w(U // 2 ** i, U // 2 ** (i + 1), k),
            stride=u, padding=(k - u) // 2))
        if i >= num_up - top_k:
            ks, ss = uks[i - 1], rates[i - 1]
            params["nn_up"].append(pack_conv_transpose(
                *convT_w(init_ch, U // 2 ** i, ks), stride=ss, padding=(ks - ss) // 2))
            init_ch = U // 2 ** i
        if i > num_up - top_k:
            params["resid"].append(pack_conv(*conv_w(U // 2 ** i, U // 2 ** (i + 1), 1)))

    params["resblocks"] = []
    for i in range(num_up):
        ch = U // 2 ** (i + 1)
        stage = []
        for (k, _d) in zip(cfg["resblock_kernel_sizes"], cfg["resblock_dilation_sizes"]):
            convs = []
            for _it in range(4):
                convs.append(conv_w(ch, ch, k))   # convs1[it]
                convs.append(conv_w(ch, ch, k))   # convs2[it]
            stage.append(pack_resblock(convs, ch, k))
        params["resblocks"].append(stage)

    params["conv_post"] = pack_conv(*conv_w(U // 2 ** num_up, 1, 7))
    return params


# =============================================================================
# Forward graph (glue in plain JAX, all convs / resblocks in Pallas)
# =============================================================================
def generator_forward(params, cfg, x):
    rates = cfg["upsample_rates"]
    top_k = cfg["top_k"]
    num_up = len(rates)
    rb_cfg = tuple((int(k), tuple(int(dd) for dd in d))
                   for k, d in zip(cfg["resblock_kernel_sizes"],
                                   cfg["resblock_dilation_sizes"]))

    mel = x
    x = pallas_conv1d(x, params["conv_pre"], padding=3)
    output = None
    for i in range(num_up):
        add_in = None
        if i >= num_up - top_k:
            j = i - (num_up - top_k)
            mel = pallas_conv_transpose1d(mel, params["nn_up"][j])
            add_in = mel                    # 'x += mel' is fused into the consumers
        if i > num_up - top_k:
            r = i - (num_up - top_k) - 1
            if output is not None:
                src = pallas_conv1d(output, params["resid"][r], padding=0)
            else:
                # src = x + mel; the add is fused into the 1x1 conv kernel
                src = pallas_conv1d(x, params["resid"][r], padding=0, add=add_in)
            # 1x1 conv is pointwise in time: conv-then-repeat == repeat-then-conv
            # (rate x less matmul work / HBM read).  XLA fuses this repeat into the
            # `output + x` add below.
            output = jnp.repeat(src, rates[i], axis=-1)
        # F.leaky_relu(x + mel, LRELU_SLOPE) fused into the transposed-conv kernel.
        x = pallas_conv_transpose1d(x, params["ups"][i], add=add_in,
                                    lrelu_slope=LRELU_SLOPE)
        # Whole stage (all resblocks, residual adds, mean) fused into one pallas_call.
        x = resblock_stage(x, params["resblocks"][i], rb_cfg)
        if output is not None:
            # TODO(synk): fuse this accumulation (and the repeat above) into the
            # resblock-stage kernel to remove the remaining XLA-side HBM round trip.
            output = output + x
    # F.leaky_relu(., 0.01) + conv_post + tanh fused into one kernel; final output f32.
    return pallas_conv1d(output, params["conv_post"], padding=3,
                         lrelu_slope=0.01, post_tanh=True, out_dtype=jnp.float32)


# =============================================================================
# Plain-JAX references for self-tests
# =============================================================================
def _ref_conv1d(x, w_pt, b, dilation, padding):
    out = lax.conv_general_dilated(
        x, w_pt, window_strides=(1,), padding=[(padding, padding)],
        rhs_dilation=(dilation,), dimension_numbers=("NCH", "OIH", "NCH"),
        precision=lax.Precision.HIGHEST)
    return out + b[None, :, None]


def _ref_conv_transpose1d(x, w_pt_t, b, stride, padding):
    k = w_pt_t.shape[-1]
    w_conv = jnp.flip(jnp.transpose(w_pt_t, (1, 0, 2)), axis=-1)   # (C_out, C_in, K)
    out = lax.conv_general_dilated(
        x, w_conv, window_strides=(1,),
        padding=[(k - 1 - padding, k - 1 - padding)],
        lhs_dilation=(stride,), dimension_numbers=("NCH", "OIH", "NCH"),
        precision=lax.Precision.HIGHEST)
    return out + b[None, :, None]


def _ref_resblock_stage(x, stage_raw, rb_cfg):
    xs = jnp.zeros_like(x)
    for (k, dils), convs in zip(rb_cfg, stage_raw):
        cur = x
        for it in range(4):
            w1, b1 = convs[2 * it]
            w2, b2 = convs[2 * it + 1]
            t1 = jnp.where(cur >= 0, cur, LRELU_SLOPE * cur)
            h = _ref_conv1d(t1, w1, b1, dils[it], get_padding(k, dils[it]))
            t2 = jnp.where(h >= 0, h, LRELU_SLOPE * h)
            h2 = _ref_conv1d(t2, w2, b2, 1, get_padding(k, 1))
            cur = cur + h2
        xs = xs + cur
    return xs / len(rb_cfg)


if __name__ == "__main__":
    cfg = dict(
        mel_dim=8,
        upsample_init_channel=32,
        upsample_rates=[2, 2, 2],
        upsample_kernel_sizes=[4, 4, 4],
        top_k=2,
        resblock_kernel_sizes=[3, 5],
        resblock_dilation_sizes=[[1, 3, 5, 7], [1, 3, 5, 7]],
    )
    B, T = 2, 8
    key = jax.random.PRNGKey(0)
    pkey, xkey, tkey = jax.random.split(key, 3)

    # --- self-test 1: dilated 'same' Conv1d (untiled + time-tiled) vs lax ----------
    k1, k2, k3 = jax.random.split(tkey, 3)
    ci, co, kk, dil = 16, 16, 7, 2
    pad = get_padding(kk, dil)
    wt = jax.random.normal(k2, (co, ci, kk), jnp.float32) * 0.05
    bt = jax.random.normal(k3, (co,), jnp.float32) * 0.05
    pw = pack_conv(wt, bt)
    for tlen in (40, 1300):                 # 40 -> untiled path, 1300 -> tiled path
        xt = jax.random.normal(k1, (2, ci, tlen), jnp.float32)
        y_pal = pallas_conv1d(xt, pw, dilation=dil, padding=pad).astype(jnp.float32)
        y_ref = _ref_conv1d(xt, wt, bt, dil, pad)
        assert y_pal.shape == y_ref.shape
        assert float(jnp.max(jnp.abs(y_pal - y_ref))) < 7.5e-2

    # --- self-test 2: polyphase ConvTranspose1d (untiled + tiled) vs lax -----------
    k4, k5, k6 = jax.random.split(k3, 3)
    wtr = jax.random.normal(k4, (16, 8, 4), jnp.float32) * 0.05
    btr = jax.random.normal(k5, (8,), jnp.float32) * 0.05
    ptr = pack_conv_transpose(wtr, btr, stride=2, padding=1)
    for tlen in (50, 1500):
        xtr = jax.random.normal(k6, (2, 16, tlen), jnp.float32)
        y_pal = pallas_conv_transpose1d(xtr, ptr).astype(jnp.float32)
        y_ref = _ref_conv_transpose1d(xtr, wtr, btr, 2, 1)
        assert y_pal.shape == y_ref.shape
        assert float(jnp.max(jnp.abs(y_pal - y_ref))) < 7.5e-2

    # --- self-test 3: fused ResBlock stage (untiled + time-tiled) vs lax chain -----
    rb_cfg = ((3, (1, 3, 5, 7)), (5, (1, 3, 5, 7)))
    crb = 16
    rkeys = iter(jax.random.split(k6, 64))
    stage_raw, stage_packed = [], []
    for (kk2, _d) in rb_cfg:
        convs = []
        for _ in range(8):
            convs.append((jax.random.normal(next(rkeys), (crb, crb, kk2),
                                            jnp.float32) * 0.05,
                          jax.random.normal(next(rkeys), (crb,), jnp.float32) * 0.05))
        stage_raw.append(convs)
        stage_packed.append(pack_resblock(convs, crb, kk2))
    for tlen in (50, 1100):
        xrb = jax.random.normal(next(rkeys), (1, crb, tlen), jnp.float32)
        y_pal = resblock_stage(xrb, stage_packed, rb_cfg, out_dtype=jnp.float32)
        y_ref = _ref_resblock_stage(xrb, stage_raw, rb_cfg)
        assert y_pal.shape == y_ref.shape
        assert float(jnp.max(jnp.abs(y_pal - y_ref))) < 1e-1

    # --- full generator forward -----------------------------------------------------
    params = init_generator_params(pkey, cfg)
    x = jax.random.normal(xkey, (B, cfg["mel_dim"], T), jnp.float32)   # (B, C, T)
    fwd = jax.jit(lambda inp: generator_forward(params, cfg, inp))
    y = jax.block_until_ready(fwd(x))

    expected_T = T
    for u in cfg["upsample_rates"]:
        expected_T *= u
    assert y.shape == (B, 1, expected_T), y.shape
    assert bool(jnp.all(jnp.isfinite(y)))
    assert bool(jnp.all(jnp.abs(y) <= 1.0))   # tanh output range
    print("KERNEL_OK")
</pallas_src>

<mosaic_0001>
module attributes {stable_mosaic.version = 11 : i64} {
  func.func @kernel(%arg0: i32, %arg1: memref<1x16x40xf32, #tpu.memory_space<vmem>>, %arg2: memref<7x16x16xbf16, #tpu.memory_space<vmem>>, %arg3: memref<16x1xf32, #tpu.memory_space<vmem>>, %arg4: memref<1x16x40xbf16, #tpu.memory_space<vmem>>) attributes {dimension_semantics = [#tpu.dimension_semantics<parallel>], iteration_bounds = array<i64: 2>, scalar_prefetch = 0 : i64, scratch_operands = 0 : i64, tpu.core_type = #tpu.core_type<tc>, window_params = [{transform_indices = @transform_0, window_bounds = array<i64: 1, 16, 40>}, {pipeline_mode = #tpu.pipeline_mode<synchronous>, transform_indices = @transform_1, window_bounds = array<i64: 7, 16, 16>}, {pipeline_mode = #tpu.pipeline_mode<synchronous>, transform_indices = @transform_2, window_bounds = array<i64: 16, 1>}, {transform_indices = @transform_3, window_bounds = array<i64: 1, 16, 40>}]} {
    %c0 = arith.constant 0 : index
    %c0_0 = arith.constant 0 : index
    %c0_1 = arith.constant 0 : index
    %0 = vector.load %arg1[%c0, %c0_0, %c0_1] : memref<1x16x40xf32, #tpu.memory_space<vmem>>, vector<1x16x40xf32>
    %1 = vector.shape_cast %0 : vector<1x16x40xf32> to vector<16x40xf32>
    %2 = arith.truncf %1 : vector<16x40xf32> to vector<16x40xbf16>
    %cst = arith.constant 0.000000e+00 : bf16
    %3 = vector.broadcast %cst : bf16 to vector<16x6xbf16>
    %cst_2 = arith.constant 0.000000e+00 : bf16
    %4 = vector.broadcast %cst_2 : bf16 to vector<16x6xbf16>
    %5 = tpu.concatenate %3, %2, %4 in 1 : vector<16x6xbf16>, vector<16x40xbf16>, vector<16x6xbf16> -> vector<16x52xbf16>
    %cst_3 = arith.constant 0.000000e+00 : f32
    %6 = vector.broadcast %cst_3 : f32 to vector<16x40xf32>
    %c0_4 = arith.constant 0 : index
    %c0_5 = arith.constant 0 : index
    %c0_6 = arith.constant 0 : index
    %7 = vector.load %arg2[%c0_4, %c0_5, %c0_6] : memref<7x16x16xbf16, #tpu.memory_space<vmem>>, vector<1x16x16xbf16>
    %8 = vector.shape_cast %7 : vector<1x16x16xbf16> to vector<16x16xbf16>
    %9 = vector.extract_strided_slice %5 {offsets = [0, 0], sizes = [16, 40], strides = [1, 1]} : vector<16x52xbf16> to vector<16x40xbf16>
    %cst_7 = arith.constant dense<0.000000e+00> : vector<16x40xf32>
    %10 = tpu.matmul %8, %9, %cst_7 {dimension_numbers = #tpu.dot_dimension_numbers<[1], [0], [0], [1], [0, 0, 1, 1], [], []>} : vector<16x16xbf16>, vector<16x40xbf16>, vector<16x40xf32> -> vector<16x40xf32>
    %11 = arith.addf %6, %10 : vector<16x40xf32>
    %c1 = arith.constant 1 : index
    %c0_8 = arith.constant 0 : index
    %c0_9 = arith.constant 0 : index
    %12 = vector.load %arg2[%c1, %c0_8, %c0_9] : memref<7x16x16xbf16, #tpu.memory_space<vmem>>, vector<1x16x16xbf16>
    %13 = vector.shape_cast %12 : vector<1x16x16xbf16> to vector<16x16xbf16>
    %14 = vector.extract_strided_slice %5 {offsets = [0, 2], sizes = [16, 40], strides = [1, 1]} : vector<16x52xbf16> to vector<16x40xbf16>
    %cst_10 = arith.constant dense<0.000000e+00> : vector<16x40xf32>
    %15 = tpu.matmul %13, %14, %cst_10 {dimension_numbers = #tpu.dot_dimension_numbers<[1], [0], [0], [1], [0, 0, 1, 1], [], []>} : vector<16x16xbf16>, vector<16x40xbf16>, vector<16x40xf32> -> vector<16x40xf32>
    %16 = arith.addf %11, %15 : vector<16x40xf32>
    %c2 = arith.constant 2 : index
    %c0_11 = arith.constant 0 : index
    %c0_12 = arith.constant 0 : index
    %17 = vector.load %arg2[%c2, %c0_11, %c0_12] : memref<7x16x16xbf16, #tpu.memory_space<vmem>>, vector<1x16x16xbf16>
    %18 = vector.shape_cast %17 : vector<1x16x16xbf16> to vector<16x16xbf16>
    %19 = vector.extract_strided_slice %5 {offsets = [0, 4], sizes = [16, 40], strides = [1, 1]} : vector<16x52xbf16> to vector<16x40xbf16>
    %cst_13 = arith.constant dense<0.000000e+00> : vector<16x40xf32>
    %20 = tpu.matmul %18, %19, %cst_13 {dimension_numbers = #tpu.dot_dimension_numbers<[1], [0], [0], [1], [0, 0, 1, 1], [], []>} : vector<16x16xbf16>, vector<16x40xbf16>, vector<16x40xf32> -> vector<16x40xf32>
    %21 = arith.addf %16, %20 : vector<16x40xf32>
    %c3 = arith.constant 3 : index
    %c0_14 = arith.constant 0 : index
    %c0_15 = arith.constant 0 : index
    %22 = vector.load %arg2[%c3, %c0_14, %c0_15] : memref<7x16x16xbf16, #tpu.memory_space<vmem>>, vector<1x16x16xbf16>
    %23 = vector.shape_cast %22 : vector<1x16x16xbf16> to vector<16x16xbf16>
    %24 = vector.extract_strided_slice %5 {offsets = [0, 6], sizes = [16, 40], strides = [1, 1]} : vector<16x52xbf16> to vector<16x40xbf16>
    %cst_16 = arith.constant dense<0.000000e+00> : vector<16x40xf32>
    %25 = tpu.matmul %23, %24, %cst_16 {dimension_numbers = #tpu.dot_dimension_numbers<[1], [0], [0], [1], [0, 0, 1, 1], [], []>} : vector<16x16xbf16>, vector<16x40xbf16>, vector<16x40xf32> -> vector<16x40xf32>
    %26 = arith.addf %21, %25 : vector<16x40xf32>
    %c4 = arith.constant 4 : index
    %c0_17 = arith.constant 0 : index
    %c0_18 = arith.constant 0 : index
    %27 = vector.load %arg2[%c4, %c0_17, %c0_18] : memref<7x16x16xbf16, #tpu.memory_space<vmem>>, vector<1x16x16xbf16>
    %28 = vector.shape_cast %27 : vector<1x16x16xbf16> to vector<16x16xbf16>
    %29 = vector.extract_strided_slice %5 {offsets = [0, 8], sizes = [16, 40], strides = [1, 1]} : vector<16x52xbf16> to vector<16x40xbf16>
    %cst_19 = arith.constant dense<0.000000e+00> : vector<16x40xf32>
    %30 = tpu.matmul %28, %29, %cst_19 {dimension_numbers = #tpu.dot_dimension_numbers<[1], [0], [0], [1], [0, 0, 1, 1], [], []>} : vector<16x16xbf16>, vector<16x40xbf16>, vector<16x40xf32> -> vector<16x40xf32>
    %31 = arith.addf %26, %30 : vector<16x40xf32>
    %c5 = arith.constant 5 : index
    %c0_20 = arith.constant 0 : index
    %c0_21 = arith.constant 0 : index
    %32 = vector.load %arg2[%c5, %c0_20, %c0_21] : memref<7x16x16xbf16, #tpu.memory_space<vmem>>, vector<1x16x16xbf16>
    %33 = vector.shape_cast %32 : vector<1x16x16xbf16> to vector<16x16xbf16>
    %34 = vector.extract_strided_slice %5 {offsets = [0, 10], sizes = [16, 40], strides = [1, 1]} : vector<16x52xbf16> to vector<16x40xbf16>
    %cst_22 = arith.constant dense<0.000000e+00> : vector<16x40xf32>
    %35 = tpu.matmul %33, %34, %cst_22 {dimension_numbers = #tpu.dot_dimension_numbers<[1], [0], [0], [1], [0, 0, 1, 1], [], []>} : vector<16x16xbf16>, vector<16x40xbf16>, vector<16x40xf32> -> vector<16x40xf32>
    %36 = arith.addf %31, %35 : vector<16x40xf32>
    %c6 = arith.constant 6 : index
    %c0_23 = arith.constant 0 : index
    %c0_24 = arith.constant 0 : index
    %37 = vector.load %arg2[%c6, %c0_23, %c0_24] : memref<7x16x16xbf16, #tpu.memory_space<vmem>>, vector<1x16x16xbf16>
    %38 = vector.shape_cast %37 : vector<1x16x16xbf16> to vector<16x16xbf16>
    %39 = vector.extract_strided_slice %5 {offsets = [0, 12], sizes = [16, 40], strides = [1, 1]} : vector<16x52xbf16> to vector<16x40xbf16>
    %cst_25 = arith.constant dense<0.000000e+00> : vector<16x40xf32>
    %40 = tpu.matmul %38, %39, %cst_25 {dimension_numbers = #tpu.dot_dimension_numbers<[1], [0], [0], [1], [0, 0, 1, 1], [], []>} : vector<16x16xbf16>, vector<16x40xbf16>, vector<16x40xf32> -> vector<16x40xf32>
    %41 = arith.addf %36, %40 : vector<16x40xf32>
    %c0_26 = arith.constant 0 : index
    %c0_27 = arith.constant 0 : index
    %42 = vector.load %arg3[%c0_26, %c0_27] : memref<16x1xf32, #tpu.memory_space<vmem>>, vector<16x1xf32>
    %43 = vector.broadcast %42 : vector<16x1xf32> to vector<16x40xf32>
    %44 = arith.addf %41, %43 : vector<16x40xf32>
    %45 = vector.shape_cast %44 : vector<16x40xf32> to vector<1x16x40xf32>
    %46 = arith.truncf %45 : vector<1x16x40xf32> to vector<1x16x40xbf16>
    %c0_28 = arith.constant 0 : index
    %c0_29 = arith.constant 0 : index
    %c0_30 = arith.constant 0 : index
    %47 = vector.load %arg4[%c0_28, %c0_29, %c0_30] : memref<1x16x40xbf16, #tpu.memory_space<vmem>>, vector<1x16x40xbf16>
    tpu.vector_store %arg4[%c0_28, %c0_29, %c0_30], %46 {strides = array<i32>} : memref<1x16x40xbf16, #tpu.memory_space<vmem>>, vector<1x16x40xbf16>,
    return
  }
  func.func @transform_0(%arg0: i32) -> (i32, i32, i32) {
    %c0_i32 = arith.constant 0 : i32
    %c0_i32_0 = arith.constant 0 : i32
    %c0_i32_1 = arith.constant 0 : i32
    return %arg0, %c0_i32, %c0_i32_0 : i32, i32, i32
  }
  func.func @transform_1(%arg0: i32) -> (i32, i32, i32) {
    %c0_i32 = arith.constant 0 : i32
    %c0_i32_0 = arith.constant 0 : i32
    %c0_i32_1 = arith.constant 0 : i32
    %c0_i32_2 = arith.constant 0 : i32
    return %c0_i32, %c0_i32_0, %c0_i32_1 : i32, i32, i32
  }
  func.func @transform_2(%arg0: i32) -> (i32, i32) {
    %c0_i32 = arith.constant 0 : i32
    %c0_i32_0 = arith.constant 0 : i32
    %c0_i32_1 = arith.constant 0 : i32
    return %c0_i32, %c0_i32_0 : i32, i32
  }
  func.func @transform_3(%arg0: i32) -> (i32, i32, i32) {
    %c0_i32 = arith.constant 0 : i32
    %c0_i32_0 = arith.constant 0 : i32
    %c0_i32_1 = arith.constant 0 : i32
    return %arg0, %c0_i32, %c0_i32_0 : i32, i32, i32
  }
}

</mosaic_0001>

<bundles_post_ra>
// kernel: tpu_custom_call.1
= control target key start
LH: loop header
LB: loop body
LE: loop exit
PB: predicated region body
PF: predicated region fallthrough
CT: control target
= control target key end

     0   :  { %8 = vsyncpa [#allocation3], 0  ;;  %s1312_s0 = inlined_call_operand.hbm [shape: f32[2,16,40], index: 0, kind: input, shape index: {}]   ;;  %s1313_s1 = inlined_call_operand.hbm [shape: bf16[7,16,16], index: 1, kind: input, shape index: {}]   ;;  %s1314_s2 = inlined_call_operand.vmem [shape: f32[16,1], index: 2, kind: input, shape index: {}]   ;;  %s1315_s3 = inlined_call_operand.hbm [shape: bf16[2,16,40], index: 3, kind: output, shape index: {}]  }
   0x1   :  { %10 = vsyncpa [#allocation3 + $0x1], 0 }
   0x2   :  { %11 = vsyncpa [#allocation6], 0 }
   0x3   :  { %12 = vsyncpa [#allocation4], 0 }
   0x4   :  { %14 = vsyncpa [#allocation4 + $0x1], 0  ;;  %s1076_s12 = smov 0   ;;  %s1078_s13 = smov 0  }
   0x5   :  { %s1080_s14 = smov 0   ;;  %s1082_s15 = smov 0  }
   0x6 LB: > { %s1097_s16 = sadd.s32 4294967295, %s1035_s15   ;;  %s733_s17 = sadd.s32 4294967294, %s1035_s15   ;;  %s1035_s15 = sphi %s1082_s15, %s1335_s15   ;;  %s1031_s14 = sphi %s1080_s14, %s1334_s14   ;;  %s1027_s13 = sphi %s1078_s13, %s1333_s13   ;;  %s1023_s12 = sphi %s1076_s12, %s1332_s12  }
   0x7   : > { %p40_p0 = scmp.ne.s32.totalorder %s1027_s13, %s1023_s12  ;;  %p1316_p1 = scmp.eq.s32.totalorder %s1097_s16, 0 }
   0x8   : > { %p112_p3 = scmp.eq.s32.totalorder %s733_s17, 1  ;;  %p734_p5 = scmp.ge.s32.totalorder %s1035_s15, 1 }
   0x9   : > { %p1106_p4 = por %p1316_p1, %p40_p0  ;;  %p119_p7 = scmp.lt.s32.totalorder %s1035_s15, 3 }
   0xa   : > { %p1111_p6 = por %p112_p3, %p40_p0  ;;  %s1037_s21 = smov [#allocation5]  }
   0xb   : > { %s1319_s18 = scalar_select %p1106_p4, 1, 0 }
   0xc   : > { %s1320_s19 = scalar_select %p1111_p6, 1, 0 }
   0xd   : > { %p1116_p8 = pnand %p734_p5, %p119_p7  ;;  %s131_s22 = sshll.u32 %s1037_s21, 4  ;;  %s1120_s22 = int_to_ptr.vmem [resolvable:$true] %s131_s22 }
   0xe   : > { %s1132_s24 = sadd.s32 1, %s1035_s15   ;;  %s27_s25 = sadd.s32 1, %s1031_s14 }
   0xf   : > { %s1321_s20 = scalar_select %p1116_p8, 1, 0 }
  0x10   : > { %p833_p9 = pneg %p1116_p8  ;;  %s24_s26 = ssub.s32 %s1035_s15, %s1132_s24 }
  0x11   : > { %s907_s29 = scalar_lea.hbm %s1313_s1, 896 }
  0x12   : > { %p1127_p11 = pnand %p833_p9, %p1316_p1  ;;  %p908_p12 = scmp.ne.s32.totalorder %s1313_s1, %s907_s29 }
  0x13   : > { %p914_p5 = scmp.lt.u32.totalorder %s907_s29, %s1313_s1 }
  0x14   : > { %p909_p13 = pneg %p1127_p11 }
  0x16   : > { %p910_p0 = pnand %p909_p13, %p908_p12 }
  0x18   : > { %p911_p3 = pneg %p910_p0 }
  0x1a   : > { %p916_p7 = pnand %p914_p5, %p911_p3 }
  0x1c   : > { %919 = shalt.err (!%p916_p7)
}
  0x1d   : > { %s920_s7 = scalar_lea.vmem %s1120_s22, 896  ;;  %p928_p2 = scmp.lt.s32.totalorder %s1120_s22, %s1120_s22 }
  0x1e   : > { %p921_p9 = scmp.ne.s32.totalorder %s1120_s22, %s920_s7  ;;  %p929_p6 = scmp.lt.s32.totalorder %s920_s7, %s920_s7 }
  0x20   : > { %p923_p10 = pnand %p921_p9, %p909_p13  ;;  %p930_p4 = por %p929_p6, %p928_p2 }
  0x22   : > { %p924_p1 = pneg %p923_p10 }
  0x24   : > { %p931_p8 = pnand %p930_p4, %p924_p1 }
  0x26   : > { %934 = shalt.err (!%p931_p8)
}
  0x27   : > { %s1038_s8 = smov 64   ;;  %s1039_s9 = smov 4  }
  0x28   : > { %836 = dma.hbm_to_vmem [thread:$0]  (!%p1127_p11), %s1313_s1, 896, %s1120_s22, [#allocation6], %s1038_s8, %s1038_s8, %s1039_s9  }
  0x29   : > { %p25_p2 = scmp.eq.s32.totalorder %s24_s26, 0  ;;  %p34_p1 = scmp.ne.s32.totalorder %s1031_s14, %s1027_s13 }
  0x2a   : > { %p35_p4 = scmp.eq.s32.totalorder %s1035_s15, 0  ;;  %p846_p6 = scmp.lt.s32.totalorder %s1035_s15, 2 }
  0x2b   : > { %s1163_s17 = scalar_select %p25_p2, %s1031_s14, %s27_s25  }
  0x2c   : > { %p36_p8 = por %p35_p4, %p34_p1  ;;  %p1323_p10 = scmp.eq.s32.totalorder %s1097_s16, 1 }
  0x2d   : > { %s148_s27 = sand.u32 1, %s1031_s14   ;;  %s765_s28 = sshll.u32 %s1035_s15, 8 }
  0x2e   : > { %p1167_p12 = por %p1323_p10, %p34_p1  ;;  %s737_s29 = sshll.u32 %s148_s27, 4 }
  0x2f   : > { %s1176_s4 = scalar_lea.hbm %s1312_s0, %s765_s28  ;;  %s152_s22 = scalar_lea.vmem [#allocation2], %s737_s29 }
  0x30   : > { %s159_s25 = sshll.u32 %s152_s22, 4  ;;  %p1178_p11 = pnand %p846_p6, %p36_p8  ;;  %s1182_s25 = int_to_ptr.vmem [resolvable:$true] %s159_s25 }
  0x31   : > { %s1184_s5 = scalar_lea.sflag [#allocation3], %s148_s27  ;;  %s935_s6 = scalar_lea.hbm %s1176_s4, 256 }
  0x32   : > { %p936_p13 = scmp.ne.s32.totalorder %s1176_s4, %s935_s6  ;;  %p937_p0 = pneg %p1178_p11 }
  0x33   : > { %s940_s9 = scalar_lea.hbm %s1312_s0, 512  ;;  %p941_p7 = scmp.lt.u32.totalorder %s1176_s4, %s1312_s0 }
  0x34   : > { %p938_p3 = pnand %p937_p0, %p936_p13  ;;  %p942_p9 = scmp.lt.u32.totalorder %s940_s9, %s935_s6 }
  0x35   : > { %p944_p1 = scmp.lt.u32.totalorder %s935_s6, %s1176_s4 }
  0x36   : > { %p939_p5 = pneg %p938_p3  ;;  %p943_p2 = por %p942_p9, %p941_p7 }
  0x38   : > { %p945_p4 = por %p944_p1, %p943_p2 }
  0x3a   : > { %p946_p6 = pnand %p945_p4, %p939_p5 }
  0x3c   : > { %949 = shalt.err (!%p946_p6)
}
  0x3d   : > { %s950_s27 = scalar_lea.vmem %s1182_s25, 256  ;;  %s1040_s28 = smov [#allocation2]  }
  0x3e   : > { %p951_p8 = scmp.ne.s32.totalorder %s1182_s25, %s950_s27  ;;  %s955_s29 = sshll.u32 %s1040_s28, 4  ;;  %s956_s29 = int_to_ptr.vmem [resolvable:$false] %s955_s29 }
  0x3f   : > { %s957_s23 = scalar_lea.vmem %s956_s29, 512  ;;  %p958_p3 = scmp.lt.s32.totalorder %s1182_s25, %s956_s29 }
  0x40   : > { %p953_p10 = pnand %p951_p8, %p937_p0  ;;  %p959_p7 = scmp.lt.s32.totalorder %s957_s23, %s950_s27 }
  0x42   : > { %p954_p13 = pneg %p953_p10  ;;  %p960_p9 = por %p959_p7, %p958_p3 }
  0x44   : > { %p961_p2 = pnand %p960_p9, %p954_p13 }
  0x46   : > { %964 = shalt.err (!%p961_p2)
}
  0x47   : > { %s1041_s30 = smov 128   ;;  %s1042_s22 = smov 8  }
  0x48   : > { %840 = dma.hbm_to_vmem [thread:$0]  (!%p1178_p11), %s1176_s4, 256, %s1182_s25, %s1184_s5, %s1041_s30, %s1041_s30, %s1042_s22  }
  0x49   : > { %p1326_p0 = scmp.ne.s32.totalorder %s1321_s20, 0 }
  0x4a   : > { %s1215_s6 = sand.u32 (!%p1326_p0), 1, %s1027_s13   ;;  %p1327_p5 = scmp.ne.s32.totalorder (!%p1326_p0), %s1319_s18, 0 }
  0x4b   : > { %171 = sbr.rel (%p1326_p0) target bundleno = 583 (0x247), region = 32  ;;  %s741_s7 = sshll.u32 (!%p1326_p0), %s1215_s6, 4 }
  0x4c   : > { %s174_s8 = scalar_lea.sflag (!%p1326_p0), [#allocation3], %s1215_s6  ;;  %s177_s9 = scalar_lea.vmem (!%p1326_p0), [#allocation2], %s741_s7 }
  0x52   : > { %1010 = dma.done.wait (%p1327_p5), %s174_s8, 256  }
  0x53   : > { %1012 = vsyncadd (%p1327_p5), %s174_s8, 4294967040  ;;  %p1328_p1 = scmp.eq.s32.totalorder %s1097_s16, 0 }
  0x55   : > { %1014 = dma.done.wait (%p1328_p1), [#allocation6], 896   ;;  %p1329_p11 = pmov %p1328_p1 }
  0x56   : > { %v1043_v0 = vmov 0.0   ;;  %v205_v1 = vld [vmem:[%s177_s9] sm:$0xff]  ;;  %v206_v2 = vld [vmem:[%s177_s9 + $0x8] sm:$0xff]  ;;  %vm1044_vm0 = vmmov 0   ;;  %s1045_s18 = smov 6   ;;  %vm211_vm1 = vcmask 48128  }
  0x57   : > { %1016 = vsyncadd (%p1329_p11), [#allocation6], 4294966400  ;;  %789 = vmatprep.subr.bf16.mxu1 %v1043_v0  ;;  %783 = vmatprep.subr.bf16.mxu0 %v1043_v0  ;;  %v207_v3 = vpack.c.bf16 %v206_v2, %v205_v1  ;;  %vm215_vm2 = vcmask 375808   ;;  %s1046_s20 = smov 124   ;;  %s1047_s4 = smov 126   ;;  %v900_v7 = vld [vmem:[#allocation5] sm:$0xff]  }
  0x58   : > { %791 = vmatprep.mubr.msk.bf16.mxu1 %vm1044_vm0, %v1043_v0  ;;  %785 = vmatprep.mubr.msk.bf16.mxu0 %vm1044_vm0, %v1043_v0  ;;  %vm232_vm3 = vcmask 130048   ;;  %s1048_s25 = smov 122   ;;  %s1049_s26 = smov 120   ;;  %v611_v8 = vld [vmem:[%s1314_s2] sm:$0xff]  ;;  %v612_v9 = vld [vmem:[%s1314_s2 + $0x8] sm:$0xff]  ;;  %v1052_v10 = vmov 0  }
  0x59   : > { %209 = vrot.lane.b32.xlu0 %v207_v3, %s1045_s18  ;;  %s1050_s5 = smov 118   ;;  %s1051_s10 = smov 116   ;;  %898 = vset.pattern.permute.xlu1 %v1052_v10  ;;  %v901_v13 = vld [vmem:[#allocation5 + $0x8] sm:$0xff]   ;;  %v902_v15 = vld [vmem:[#allocation5 + $0x18] sm:$0xff]   ;;  %v903_v17 = vld [vmem:[#allocation5 + $0x10] sm:$0xff]   ;;  %vm633_vm4 = vcmask 322560  }
  0x5a   : > { %899 = vset.pattern.permute.xlu0 %v1052_v10  ;;  %v905_v19 = vld [vmem:[#allocation5 + $0x28] sm:$0xff]   ;;  %v904_v20 = vld [vmem:[#allocation5 + $0x20] sm:$0xff]   ;;  %v906_v22 = vld [vmem:[#allocation5 + $0x30] sm:$0xff]   ;;  %s743_s23 = sshll.u32 %s1215_s6, 3  ;;  %s768_s7 = sshll.u32 %s1097_s16, 7 }
  0x5b   : > { %s203_s30 = scalar_lea.vmem [#allocation7], %s743_s23  ;;  %s1266_s18 = scalar_lea.hbm %s1315_s3, %s768_s7 }
  0x5c   : > { %s650_s22 = sshll.u32 %s203_s30, 4  ;;  %s1053_s16 = smov [#allocation7]   ;;  %s1268_s22 = int_to_ptr.vmem [resolvable:$true] %s650_s22 }
  0xcb   : > { %v210_v4 = vpop.permute.xlu0 %209 }
  0xcc   : > { %v214_v5 = vsel %vm211_vm1, 0, %v210_v4 }
  0xcd   : > { %v216_v6 = vsel %vm215_vm2, %v214_v5, 0 }
  0xce   : > { %334 = vrot.lane.b32.xlu1 %v216_v6, %s1046_s20  ;;  %229 = vrot.lane.b32.xlu0 %v216_v6, %s1047_s4  ;;  %s637_s20 = scalar_lea.sflag [#allocation4], %s1215_s6  ;;  %s965_s4 = scalar_lea.vmem %s1268_s22, 128 }
  0xcf   : > { %790 = vmatpush3.bf16.msra.mxu1 %v216_v6  ;;  %p966_p4 = scmp.ne.s32.totalorder %s1268_s22, %s965_s4 }
  0xd0   : > { %801 = vmatprep.subr.bf16.mxu1 %v1043_v0 }
  0xd1   : > { %p967_p6 = pnand %p966_p4, %p1167_p12 }
  0xd2   : > { %391 = vrot.lane.b32.xlu1 %v216_v6, %s1048_s25  ;;  %448 = vrot.lane.b32.xlu0 %v216_v6, %s1049_s26  ;;  %s969_s25 = sshll.u32 %s1053_s16, 4  ;;  %s970_s25 = int_to_ptr.vmem [resolvable:$false] %s969_s25 }
  0xd3   : > { %792 = vmatmul.mubr.msk.bf16.vlgmr.msra.gmra.mrb[0].mxu1 %vm232_vm3, %v900_v7  ;;  %p968_p8 = pneg %p967_p6  ;;  %s971_s26 = scalar_lea.vmem %s970_s25, 256 }
  0xd4   : > { %803 = vmatprep.mubr.msk.bf16.mxu1 %vm1044_vm0, %v1043_v0  ;;  %p972_p10 = scmp.lt.s32.totalorder %s1268_s22, %s970_s25  ;;  %p973_p13 = scmp.lt.s32.totalorder %s971_s26, %s965_s4 }
  0xd6   : > { %505 = vrot.lane.b32.xlu1 %v216_v6, %s1050_s5  ;;  %562 = vrot.lane.b32.xlu0 %v216_v6, %s1051_s10  ;;  %p974_p3 = por %p973_p13, %p972_p10 }
  0xd8   : > { %p975_p7 = pnand %p974_p3, %p968_p8 }
  0xda   : > { %615 = vperm.xlu1 %898, %v611_v8   ;;  %620 = vperm.xlu0 %899, %v612_v9  }
 0x140   : > { %v335_v11 = vpop.permute.xlu1 %334  ;;  %v230_v12 = vpop.permute.xlu0 %229 }
 0x141   : > { %784 = vmatpush3.bf16.msra.mxu0 %v230_v12 }
 0x142   : > { %795 = vmatprep.subr.bf16.mxu0 %v1043_v0 }
 0x144   : > { %v392_v14 = vpop.permute.xlu1 %391  ;;  %786 = vmatmul.mubr.msk.bf16.vlgmr.msra.gmra.mrb[0].mxu0 %vm232_vm3, %v901_v13  ;;  %v449_v18 = vpop.permute.xlu0 %448 }
 0x145   : > { %796 = vmatpush3.bf16.msra.mxu0 %v335_v11  ;;  %802 = vmatpush3.bf16.msra.mxu1 %v392_v14 }
 0x146   : > { %813 = vmatprep.subr.bf16.mxu1 %v1043_v0  ;;  %797 = vmatprep.mubr.msk.bf16.mxu0 %vm1044_vm0, %v1043_v0 }
 0x147   : > { %807 = vmatprep.subr.bf16.mxu0 %v1043_v0 }
 0x148   : > { %v506_v16 = vpop.permute.xlu1 %505  ;;  %804 = vmatmul.mubr.msk.bf16.vlgmr.msra.gmra.mrb[4].mxu1 %vm232_vm3, %v902_v15  ;;  %v563_v21 = vpop.permute.xlu0 %562 }
 0x149   : > { %814 = vmatpush3.bf16.msra.mxu1 %v506_v16  ;;  %815 = vmatprep.mubr.msk.bf16.mxu1 %vm1044_vm0, %v1043_v0 }
 0x14c   : > { %798 = vmatmul.mubr.msk.bf16.vlgmr.msra.gmra.mrb[4].mxu0 %vm232_vm3, %v903_v17 }
 0x14d   : > { %808 = vmatpush3.bf16.msra.mxu0 %v449_v18  ;;  %809 = vmatprep.mubr.msk.bf16.mxu0 %vm1044_vm0, %v1043_v0 }
 0x14e   : > { %819 = vmatprep.subr.bf16.mxu0 %v1043_v0 }
 0x150   : > { %816 = vmatmul.mubr.msk.bf16.vlgmr.msra.gmra.mrb[8].mxu1 %vm232_vm3, %v905_v19 }
 0x154   : > { %810 = vmatmul.mubr.msk.bf16.vlgmr.msra.gmra.mrb[8].mxu0 %vm232_vm3, %v904_v20 }
 0x155   : > { %820 = vmatpush3.bf16.msra.mxu0 %v563_v21  ;;  %821 = vmatprep.mubr.msk.bf16.mxu0 %vm1044_vm0, %v1043_v0 }
 0x159   : > { %v616_v58 = vpop.permute.xlu1 %615  ;;  %v621_v62 = vpop.permute.xlu0 %620 }
 0x15c   : > { %822 = vmatmul.mubr.msk.bf16.vlgmr.msra.gmra.mrb[12].mxu0 %vm232_vm3, %v906_v22 }
 0x1a6   : > { %v319_v23 = vpop.f32.mrb[0].mxu1 }
 0x1a7   : > { %v793_v24 = vpop.f32.mrb[1].mxu1 }
 0x1a8   : > { %v322_v25 = vpop.f32.mrb[2].mxu1 }
 0x1a9   : > { %v794_v26 = vpop.f32.mrb[3].mxu1 }
 0x217   : > { %v270_v27 = vpop.f32.mrb[0].mxu0 }
 0x218   : > { %v320_v28 = vadd.f32 %v319_v23, %v270_v27  ;;  %v787_v29 = vpop.f32.mrb[1].mxu0 }
 0x219   : > { %v273_v30 = vpop.f32.mrb[2].mxu0 }
 0x21a   : > { %v323_v31 = vadd.f32 %v322_v25, %v273_v30  ;;  %v788_v32 = vpop.f32.mrb[3].mxu0 }
 0x21b   : > { %v431_v33 = vpop.f32.mrb[4].mxu1 }
 0x21c   : > { %v805_v34 = vpop.f32.mrb[5].mxu1 }
 0x21d   : > { %v434_v35 = vpop.f32.mrb[6].mxu1 }
 0x21e   : > { %v806_v36 = vpop.f32.mrb[7].mxu1 }
 0x21f   : > { %v374_v37 = vpop.f32.mrb[4].mxu0 }
 0x220   : > { %v381_v38 = vadd.f32 %v374_v37, %v320_v28  ;;  %v799_v39 = vpop.f32.mrb[5].mxu0 }
 0x221   : > { %v377_v40 = vpop.f32.mrb[6].mxu0 }
 0x222   : > { %v382_v41 = vadd.f32 %v377_v40, %v323_v31  ;;  %v438_v42 = vadd.f32 %v431_v33, %v381_v38  ;;  %v800_v43 = vpop.f32.mrb[7].mxu0 }
 0x223   : > { %v545_v44 = vpop.f32.mrb[8].mxu1 }
 0x224   : > { %v439_v45 = vadd.f32 %v434_v35, %v382_v41  ;;  %v817_v46 = vpop.f32.mrb[9].mxu1 }
 0x225   : > { %v548_v47 = vpop.f32.mrb[10].mxu1 }
 0x226   : > { %v818_v48 = vpop.f32.mrb[11].mxu1 }
 0x227   : > { %v488_v49 = vpop.f32.mrb[8].mxu0 }
 0x228   : > { %v495_v50 = vadd.f32 %v488_v49, %v438_v42  ;;  %v811_v51 = vpop.f32.mrb[9].mxu0 }
 0x229   : > { %v491_v52 = vpop.f32.mrb[10].mxu0 }
 0x22a   : > { %v496_v53 = vadd.f32 %v491_v52, %v439_v45  ;;  %v552_v54 = vadd.f32 %v545_v44, %v495_v50  ;;  %v812_v55 = vpop.f32.mrb[11].mxu0 }
 0x22c   : > { %v553_v56 = vadd.f32 %v548_v47, %v496_v53 }
 0x22f   : > { %v602_v57 = vpop.f32.mrb[12].mxu0 }
 0x230   : > { %v609_v59 = vadd.f32 %v602_v57, %v552_v54  ;;  %v823_v60 = vpop.f32.mrb[13].mxu0 }
 0x231   : > { %v605_v61 = vpop.f32.mrb[14].mxu0 }
 0x232   : > { %v623_v63 = vadd.f32 %v616_v58, %v609_v59  ;;  %v610_v0 = vadd.f32 %v605_v61, %v553_v56  ;;  %v824_v1 = vpop.f32.mrb[15].mxu0 }
 0x234   : > { %v766_v2 = vpack.c.bf16 %v623_v63, %v623_v63  ;;  %v624_v3 = vadd.f32 %v621_v62, %v610_v0 }
 0x236   : > { %634 = vst.msk [vmem:[%s203_s30] sm:$0xf] %vm633_vm4, %v766_v2  ;;  %v767_v4 = vpack.c.bf16 %v624_v3, %v624_v3 }
 0x238   : > { %635 = vst.msk [vmem:[%s203_s30 + $0x4] sm:$0xf] %vm633_vm4, %v767_v4 }
 0x239   : > { %978 = shalt.err (!%p975_p7)
}
 0x23a   : > { %s979_s5 = scalar_lea.hbm %s1266_s18, 128  ;;  %s983_s27 = scalar_lea.hbm %s1315_s3, 256 }
 0x23b   : > { %p980_p9 = scmp.ne.s32.totalorder %s1266_s18, %s979_s5  ;;  %p984_p5 = scmp.lt.u32.totalorder %s1266_s18, %s1315_s3 }
 0x23c   : > { %p985_p1 = scmp.lt.u32.totalorder %s983_s27, %s979_s5  ;;  %p987_p4 = scmp.lt.u32.totalorder %s979_s5, %s1266_s18 }
 0x23d   : > { %p981_p2 = pnand %p980_p9, %p1167_p12 }
 0x23e   : > { %p986_p11 = por %p985_p1, %p984_p5 }
 0x23f   : > { %p982_p0 = pneg %p981_p2 }
 0x240   : > { %p988_p6 = por %p987_p4, %p986_p11 }
 0x242   : > { %p989_p8 = pnand %p988_p6, %p982_p0 }
 0x244   : > { %992 = shalt.err (!%p989_p8)
}
 0x245   : > { %s1054_s23 = smov 64   ;;  %s1055_s30 = smov 4  }
 0x246   : > { %831 = dma.vmem_to_hbm [thread:$0]  (%p1167_p12), %s1268_s22, 128, %s1266_s18, %s637_s20, %s1054_s23, %s1054_s23, %s1055_s30  }
 0x247 PF: > { %s665_s7 = sand.u32 1, %s1023_s12   ;;  %p1330_p10 = scmp.ne.s32.totalorder %s1320_s19, 0 }
 0x248   : > { %p1331_p13 = scmp.ge.s32.totalorder %s1035_s15, 2  ;;  %s666_s8 = scalar_lea.sflag [#allocation4], %s665_s7 }
 0x24a   : > { %p842_p3 = pnand %p1331_p13, %p1330_p10 }
 0x24c   : > { %1018 = dma.done.wait (!%p842_p3), %s666_s8, 128  }
 0x24d   : > { %1020 = vsyncadd (!%p842_p3), %s666_s8, 4294967168  ;;  %p17_p7 = scmp.ge.s32.totalorder %s1132_s24, 4   ;;  %s1332_s12 = smov %s1027_s13 }
 0x24e   : > { %s1333_s13 = smov %s1031_s14  ;;  %s1334_s14 = smov %s1163_s17 }
 0x24f   : > { %s1335_s15 = smov %s1132_s24  ;;  %19 = sbr.rel (!%p17_p7) target bundleno = 6 (0x6), region = 87 }
 0x256   :  { %671 = vsyncpa [#allocation3], 1 }
 0x257   :  { %673 = vsyncpa [#allocation3 + $0x1], 1 }
 0x258   :  { %674 = vsyncpa [#allocation6], 1 }
 0x259   :  { %675 = vsyncpa [#allocation4], 1 }
 0x25a   :  { %677 = vsyncpa [#allocation4 + $0x1], 1 }

</bundles_post_ra>
